<compile_context>
chip_gen: v7x
topology: tpu7x:2x2x1
jax: 0.10.0
libtpu: 0.0.40
codegen_flags: <defaults>
</compile_context>

<pallas_src>
import functools

import jax
import jax.numpy as jnp
from jax import lax
from jax.experimental import pallas as pl
from jax.experimental.pallas import tpu as pltpu


def _transe_score_kernel(h_ref, r_ref, t_ref, score_ref):
    # Blocks arrive transposed: (D, TILE_N) -> triples on lanes, D on sublanes.
    # Upcast in-kernel (tables may be stored in bf16; v5e has no bf16 VPU/EUP).
    h = h_ref[...].astype(jnp.float32)
    r = r_ref[...].astype(jnp.float32)
    t = t_ref[...].astype(jnp.float32)

    def l2_normalize(x):
        # torch.nn.functional.normalize(x, 2, -1) == x / max(||x||_2, 1e-12)
        #   == x * rsqrt(max(sum(x^2), 1e-24))  (rsqrt -> EUP, sum -> XLU)
        ssq = jnp.sum(x * x, axis=0, keepdims=True)          # (1, TILE_N)
        return x * lax.rsqrt(jnp.maximum(ssq, 1e-24))

    diff = l2_normalize(h) + l2_normalize(r) - l2_normalize(t)
    # torch.norm(., p=1, dim=-1): L1 over D -> lane-dense (1, TILE_N) row.
    score_ref[...] = jnp.sum(jnp.abs(diff), axis=0, keepdims=True)


def _round_up(x, m):
    return (x + m - 1) // m * m


def transe_forward(ent_emb, rel_emb, batch_h, batch_r, batch_t, batch_y,
                   *, neg_ratio, margin, tile_n=None):
    """TransE forward.  Returns (loss, score); loss matches the PyTorch
    module's forward(), score is the per-triple L1 distance (predict())."""
    del batch_y                                  # unused by the reference forward
    if neg_ratio < 1:
        raise ValueError("neg_ratio must be >= 1 (mean over negatives).")

    n = batch_h.shape[0]
    k = neg_ratio + 1
    if n % k != 0:
        raise ValueError("batch length must be a multiple of neg_ratio + 1")

    d = ent_emb.shape[1]

    # Tile over the triple axis; multiples of 128 so output stores are
    # lane-dense.  Default picks >= 2 tiles once there is more than one
    # 128-lane slab of work (v7x megacore), capped at 1024 lanes per step to
    # amortize per-grid-step overhead.  Scratch-free; VMEM is never the limit.
    if tile_n is None:
        n128 = _round_up(n, 128)
        tile_n = 128 if n128 <= 128 else min(1024, _round_up(-(-n128 // 2), 128))
    tile_n = max(128, _round_up(tile_n, 128))
    n_pad = _round_up(n, tile_n)
    num_tiles = n_pad // tile_n

    def pad_idx(ix):
        ix = jnp.asarray(ix, jnp.int32)
        return jnp.pad(ix, (0, n_pad - n))       # padded rows gather index 0

    bh, br, bt = pad_idx(batch_h), pad_idx(batch_r), pad_idx(batch_t)

    # Wrapper-side gather (XLA gather, no per-row DMA descriptors) and
    # transpose to (D, N_pad) so the kernel sees triples on the lane axis.
    h_t = jnp.take(ent_emb, bh, axis=0).T
    r_t = jnp.take(rel_emb, br, axis=0).T
    t_t = jnp.take(ent_emb, bt, axis=0).T

    grid_spec = pltpu.PrefetchScalarGridSpec(
        num_scalar_prefetch=0,
        grid=(num_tiles,),
        in_specs=[pl.BlockSpec((d, tile_n), lambda i: (0, i)),
                  pl.BlockSpec((d, tile_n), lambda i: (0, i)),
                  pl.BlockSpec((d, tile_n), lambda i: (0, i))],
        out_specs=pl.BlockSpec((1, tile_n), lambda i: (0, i)),
    )

    score_row = pl.pallas_call(
        _transe_score_kernel,
        out_shape=jax.ShapeDtypeStruct((1, n_pad), jnp.float32),
        grid_spec=grid_spec,
        compiler_params=pltpu.CompilerParams(
            dimension_semantics=("parallel",)),          # v7x megacore-friendly
    )(h_t, r_t, t_t)

    score = score_row[0, :n]

    # Group loss on the tiny [N] score vector: positive row 0 of each group vs.
    # mean of its neg_ratio negatives; MarginRankingLoss(margin,
    # reduction='sum') with y = -1:  sum(max(0, (p - n) + margin))
    s = score.reshape(n // k, k)
    p_score = s[:, 0]
    n_score = jnp.mean(s[:, 1:], axis=1)
    loss = jnp.sum(jnp.maximum(p_score - n_score + margin, 0.0))
    return loss, score


def _xavier_uniform(key, shape):
    fan_out, fan_in = shape
    bound = jnp.sqrt(6.0 / (fan_in + fan_out))
    return jax.random.uniform(key, shape, jnp.float32, -bound, bound)


def _reference(ent_emb, rel_emb, bh, br, bt, neg_ratio, margin):
    h = ent_emb[bh]; r = rel_emb[br]; t = ent_emb[bt]
    nrm = lambda x: x / jnp.maximum(
        jnp.linalg.norm(x, axis=-1, keepdims=True), 1e-12)
    score = jnp.sum(jnp.abs(nrm(h) + nrm(r) - nrm(t)), axis=-1)
    k = neg_ratio + 1
    s = score.reshape(-1, k)
    p = s[:, 0]
    n = jnp.mean(s[:, 1:], axis=1)
    return jnp.sum(jnp.maximum(p - n + margin, 0.0)), score


if __name__ == "__main__":
    # Small, deterministic configuration.  N = 320 triples so the demo
    # exercises a multi-step grid plus column padding (320 -> 384 -> 3 tiles
    # at tile_n=128).
    num_ents, num_rels, hidden_size = 64, 16, 32
    margin, neg_ratio = 1.0, 3
    num_groups = 80
    N = num_groups * (neg_ratio + 1)        # 320 triples in the batch

    key = jax.random.PRNGKey(0)
    k_e, k_r, k_h, k_rl, k_t = jax.random.split(key, 5)
    ent_emb = _xavier_uniform(k_e, (num_ents, hidden_size))
    rel_emb = _xavier_uniform(k_r, (num_rels, hidden_size))

    batch_h = jax.random.randint(k_h, (N,), 0, num_ents, dtype=jnp.int32)
    batch_r = jax.random.randint(k_rl, (N,), 0, num_rels, dtype=jnp.int32)
    batch_t = jax.random.randint(k_t, (N,), 0, num_ents, dtype=jnp.int32)
    batch_y = jnp.ones((N,), jnp.float32)   # unused by forward (parity w/ torch)

    loss, score = transe_forward(ent_emb, rel_emb, batch_h, batch_r, batch_t,
                                 batch_y, neg_ratio=neg_ratio, margin=margin,
                                 tile_n=128)
    jax.block_until_ready((loss, score))

    ref_loss, ref_score = _reference(ent_emb, rel_emb, batch_h, batch_r,
                                     batch_t, neg_ratio, margin)
    assert score.shape == (N,)
    assert jnp.allclose(score, ref_score, atol=1e-5), "score mismatch"
    assert jnp.allclose(loss, ref_loss, atol=1e-4), "loss mismatch"

    print("KERNEL_OK")
</pallas_src>

<mosaic_0001>
module attributes {stable_mosaic.version = 11 : i64} {
  func.func @_transe_score_kernel(%arg0: i32, %arg1: memref<32x128xf32, #tpu.memory_space<vmem>>, %arg2: memref<32x128xf32, #tpu.memory_space<vmem>>, %arg3: memref<32x128xf32, #tpu.memory_space<vmem>>, %arg4: memref<1x128xf32, #tpu.memory_space<vmem>>) attributes {dimension_semantics = [#tpu.dimension_semantics<parallel>], iteration_bounds = array<i64: 3>, scalar_prefetch = 0 : i64, scratch_operands = 0 : i64, tpu.core_type = #tpu.core_type<tc>, window_params = [{transform_indices = @transform_0, window_bounds = array<i64: 32, 128>}, {transform_indices = @transform_1, window_bounds = array<i64: 32, 128>}, {transform_indices = @transform_2, window_bounds = array<i64: 32, 128>}, {transform_indices = @transform_3, window_bounds = array<i64: 1, 128>}]} {
    %c0 = arith.constant 0 : index
    %c0_0 = arith.constant 0 : index
    %0 = vector.load %arg1[%c0, %c0_0] : memref<32x128xf32, #tpu.memory_space<vmem>>, vector<32x128xf32>
    %c0_1 = arith.constant 0 : index
    %c0_2 = arith.constant 0 : index
    %1 = vector.load %arg2[%c0_1, %c0_2] : memref<32x128xf32, #tpu.memory_space<vmem>>, vector<32x128xf32>
    %c0_3 = arith.constant 0 : index
    %c0_4 = arith.constant 0 : index
    %2 = vector.load %arg3[%c0_3, %c0_4] : memref<32x128xf32, #tpu.memory_space<vmem>>, vector<32x128xf32>
    %3 = arith.mulf %0, %0 : vector<32x128xf32>
    %cst = arith.constant dense<0.000000e+00> : vector<128xf32>
    %4 = vector.multi_reduction <add>, %3, %cst [0] : vector<32x128xf32> to vector<128xf32>
    %5 = vector.shape_cast %4 : vector<128xf32> to vector<1x128xf32>
    %cst_5 = arith.constant 1.000000e-24 : f32
    %6 = vector.broadcast %cst_5 : f32 to vector<1x128xf32>
    %7 = arith.maximumf %5, %6 : vector<1x128xf32>
    %8 = math.rsqrt %7 : vector<1x128xf32>
    %9 = vector.broadcast %8 : vector<1x128xf32> to vector<32x128xf32>
    %10 = arith.mulf %0, %9 : vector<32x128xf32>
    %11 = arith.mulf %1, %1 : vector<32x128xf32>
    %cst_6 = arith.constant dense<0.000000e+00> : vector<128xf32>
    %12 = vector.multi_reduction <add>, %11, %cst_6 [0] : vector<32x128xf32> to vector<128xf32>
    %13 = vector.shape_cast %12 : vector<128xf32> to vector<1x128xf32>
    %cst_7 = arith.constant 1.000000e-24 : f32
    %14 = vector.broadcast %cst_7 : f32 to vector<1x128xf32>
    %15 = arith.maximumf %13, %14 : vector<1x128xf32>
    %16 = math.rsqrt %15 : vector<1x128xf32>
    %17 = vector.broadcast %16 : vector<1x128xf32> to vector<32x128xf32>
    %18 = arith.mulf %1, %17 : vector<32x128xf32>
    %19 = arith.addf %10, %18 : vector<32x128xf32>
    %20 = arith.mulf %2, %2 : vector<32x128xf32>
    %cst_8 = arith.constant dense<0.000000e+00> : vector<128xf32>
    %21 = vector.multi_reduction <add>, %20, %cst_8 [0] : vector<32x128xf32> to vector<128xf32>
    %22 = vector.shape_cast %21 : vector<128xf32> to vector<1x128xf32>
    %cst_9 = arith.constant 1.000000e-24 : f32
    %23 = vector.broadcast %cst_9 : f32 to vector<1x128xf32>
    %24 = arith.maximumf %22, %23 : vector<1x128xf32>
    %25 = math.rsqrt %24 : vector<1x128xf32>
    %26 = vector.broadcast %25 : vector<1x128xf32> to vector<32x128xf32>
    %27 = arith.mulf %2, %26 : vector<32x128xf32>
    %28 = arith.subf %19, %27 : vector<32x128xf32>
    %29 = math.absf %28 : vector<32x128xf32>
    %cst_10 = arith.constant dense<0.000000e+00> : vector<128xf32>
    %30 = vector.multi_reduction <add>, %29, %cst_10 [0] : vector<32x128xf32> to vector<128xf32>
    %31 = vector.shape_cast %30 : vector<128xf32> to vector<1x128xf32>
    %c0_11 = arith.constant 0 : index
    %c0_12 = arith.constant 0 : index
    %32 = vector.load %arg4[%c0_11, %c0_12] : memref<1x128xf32, #tpu.memory_space<vmem>>, vector<1x128xf32>
    tpu.vector_store %arg4[%c0_11, %c0_12], %31 {strides = array<i32>} : memref<1x128xf32, #tpu.memory_space<vmem>>, vector<1x128xf32>,
    return
  }
  func.func @transform_0(%arg0: i32) -> (i32, i32) {
    %c0_i32 = arith.constant 0 : i32
    %c0_i32_0 = arith.constant 0 : i32
    return %c0_i32, %arg0 : i32, i32
  }
  func.func @transform_1(%arg0: i32) -> (i32, i32) {
    %c0_i32 = arith.constant 0 : i32
    %c0_i32_0 = arith.constant 0 : i32
    return %c0_i32, %arg0 : i32, i32
  }
  func.func @transform_2(%arg0: i32) -> (i32, i32) {
    %c0_i32 = arith.constant 0 : i32
    %c0_i32_0 = arith.constant 0 : i32
    return %c0_i32, %arg0 : i32, i32
  }
  func.func @transform_3(%arg0: i32) -> (i32, i32) {
    %c0_i32 = arith.constant 0 : i32
    %c0_i32_0 = arith.constant 0 : i32
    return %c0_i32, %arg0 : i32, i32
  }
}

</mosaic_0001>

<bundles_post_ra>
// kernel: tpu_custom_call.1
= control target key start
LH: loop header
LB: loop body
LE: loop exit
PB: predicated region body
PF: predicated region fallthrough
CT: control target
= control target key end

     0   :  { %s999_s0 = inlined_call_operand.hbm [shape: f32[32,384], index: 0, kind: input, shape index: {}]   ;;  %s1000_s1 = inlined_call_operand.hbm [shape: f32[32,384], index: 1, kind: input, shape index: {}]   ;;  %s1001_s2 = inlined_call_operand.hbm [shape: f32[32,384], index: 2, kind: input, shape index: {}]   ;;  %s1002_s3 = inlined_call_operand.hbm [shape: f32[1,384], index: 3, kind: output, shape index: {}]  }
   0x1   :  { %1011 = sst [smem:[#allocation13_spill]] %s999_s0 }
   0x2   :  { %1012 = sst [smem:[#allocation14_spill]] %s1000_s1 }
   0x3   :  { %8 = vsyncpa [#allocation3], 0 }
   0x4   :  { %10 = vsyncpa [#allocation3 + $0x1], 0 }
   0x5   :  { %11 = vsyncpa [#allocation6], 0 }
   0x6   :  { %13 = vsyncpa [#allocation6 + $0x1], 0 }
   0x7   :  { %14 = vsyncpa [#allocation4], 0 }
   0x8   :  { %16 = vsyncpa [#allocation4 + $0x1], 0  ;;  %s745_s12 = smov 0   ;;  %s747_s13 = smov 0  }
   0x9   :  { %s749_s14 = smov 0   ;;  %s751_s15 = smov 0  }
   0xa LB: > { %s766_s16 = sadd.s32 4294967295, %s716_s15   ;;  %s475_s17 = sadd.s32 4294967294, %s716_s15   ;;  %s716_s15 = sphi %s751_s15, %s1035_s15   ;;  %s712_s14 = sphi %s749_s14, %s1034_s14   ;;  %s708_s13 = sphi %s747_s13, %s1033_s13   ;;  %s704_s12 = sphi %s745_s12, %s1032_s12  }
   0xb   : > { %s770_s18 = sadd.s32 1, %s716_s15   ;;  %s29_s19 = sadd.s32 1, %s712_s14 }
   0xc   : > { %s26_s20 = ssub.s32 %s716_s15, %s770_s18  ;;  %p36_p0 = scmp.ne.s32.totalorder %s712_s14, %s708_s13 }
   0xd   : > { %p27_p1 = scmp.eq.s32.totalorder %s26_s20, 0  ;;  %p37_p2 = scmp.eq.s32.totalorder %s716_s15, 0 }
   0xe   : > { %p42_p3 = scmp.ne.s32.totalorder %s708_s13, %s704_s12  ;;  %p43_p4 = scmp.eq.s32.totalorder %s766_s16, 0 }
   0xf   : > { %s782_s21 = scalar_select %p27_p1, %s712_s14, %s29_s19  }
  0x10   : > { %p38_p5 = por %p37_p2, %p36_p0  ;;  %p784_p6 = por %p43_p4, %p42_p3 }
  0x11   : > { %1013 = sst [smem:[#allocation12_spill]] %s782_s21  ;;  %p118_p7 = scmp.eq.s32.totalorder %s766_s16, 2 }
  0x12   : > { %s1014_s22 = scalar_select %p784_p6, 1, 0 }
  0x13   : > { %p124_p8 = scmp.eq.s32.totalorder %s475_s17, 2  ;;  %p513_p9 = scmp.lt.s32.totalorder %s716_s15, 3 }
  0x14   : > { %p790_p10 = por %p118_p7, %p36_p0  ;;  %s144_s25 = sand.u32 1, %s712_s14  }
  0x15   : > { %p794_p11 = por %p124_p8, %p42_p3  ;;  %s800_s26 = sshll.u32 %s716_s15, 7 }
  0x16   : > { %s1015_s23 = scalar_select %p790_p10, 1, 0 }
  0x17   : > { %s1016_s24 = scalar_select %p794_p11, 1, 0 }
  0x18   : > { %s804_s27 = sshll.u32 %s144_s25, 5  ;;  %p806_p12 = pnand %p513_p9, %p38_p5 }
  0x19   : > { %s164_s29 = sand.u32 1, %s716_s15   ;;  %s1018_s1 = sld [smem:[#allocation14_spill]] }
  0x1a   : > { %s168_s6 = scalar_lea.vmem [#allocation5], %s804_s27  ;;  %s822_s8 = scalar_lea.sflag [#allocation6], %s164_s29 }
  0x1b   : > { %s174_s7 = sshll.u32 %s168_s6, 4  ;;  %p828_p2 = pneg %p806_p12  ;;  %s819_s7 = int_to_ptr.vmem [resolvable:$true] %s174_s7 }
  0x1f   : > { %s815_s5 = scalar_lea.hbm %s1018_s1, %s800_s26  ;;  %s561_s19 = scalar_lea.hbm %s1018_s1, 1536 }
  0x20   : > { %s556_s9 = scalar_lea.hbm %s815_s5, 512  ;;  %p562_p5 = scmp.lt.u32.totalorder %s815_s5, %s1018_s1 }
  0x21   : > { %p557_p1 = scmp.ne.s32.totalorder %s815_s5, %s556_s9  ;;  %p563_p7 = scmp.lt.u32.totalorder %s561_s19, %s556_s9 }
  0x22   : > { %p565_p9 = scmp.lt.u32.totalorder %s556_s9, %s815_s5 }
  0x23   : > { %p559_p3 = pnand %p828_p2, %p557_p1  ;;  %p564_p8 = por %p563_p7, %p562_p5 }
  0x25   : > { %p560_p4 = pneg %p559_p3  ;;  %p566_p13 = por %p565_p9, %p564_p8 }
  0x27   : > { %p567_p0 = pnand %p566_p13, %p560_p4 }
  0x29   : > { %570 = shalt.err (!%p567_p0)
}
  0x2a   : > { %s571_s29 = scalar_lea.vmem %s819_s7, 512  ;;  %s718_s4 = smov [#allocation5]  }
  0x2b   : > { %p572_p1 = scmp.ne.s32.totalorder %s819_s7, %s571_s29  ;;  %s576_s6 = sshll.u32 %s718_s4, 4  ;;  %s577_s6 = int_to_ptr.vmem [resolvable:$false] %s576_s6 }
  0x2c   : > { %s578_s11 = scalar_lea.vmem %s577_s6, 1024  ;;  %p579_p10 = scmp.lt.s32.totalorder %s819_s7, %s577_s6 }
  0x2d   : > { %p574_p3 = pnand %p572_p1, %p828_p2  ;;  %p580_p6 = scmp.lt.s32.totalorder %s578_s11, %s571_s29 }
  0x2f   : > { %p575_p11 = pneg %p574_p3  ;;  %p581_p5 = por %p580_p6, %p579_p10 }
  0x31   : > { %p582_p7 = pnand %p581_p5, %p575_p11 }
  0x33   : > { %585 = shalt.err (!%p582_p7)
}
  0x34   : > { %s1005_s9 = smov 384   ;;  %s1007_s17 = smov 128  }
  0x35   : > { %s1009_s19 = smov 8   ;;  %p1020_p6 = scmp.lt.s32.totalorder %s716_s15, 4 }
  0x36   : > { %505 = dma.hbm_to_vmem [thread:$0]  (!%p806_p12), %s815_s5, 512, %s819_s7, %s822_s8, %s1005_s9, %s1007_s17, %s1009_s19  }
  0x37   : > { %p1021_p10 = scmp.ge.s32.totalorder %s716_s15, 1  ;;  %s1023_s0 = sld [smem:[#allocation13_spill]] }
  0x38   : > { %s148_s6 = scalar_lea.vmem [#allocation2], %s804_s27  ;;  %s876_s9 = scalar_lea.hbm %s1001_s2, %s800_s26 }
  0x39   : > { %p859_p11 = pnand %p1021_p10, %p1020_p6  ;;  %s154_s11 = sshll.u32 %s148_s6, 4  ;;  %s870_s11 = int_to_ptr.vmem [resolvable:$true] %s154_s11 }
  0x3a   : > { %s880_s17 = scalar_lea.sflag [#allocation3], %s144_s25 }
  0x3b   : > { %s1022_s20 = scalar_select %p859_p11, 1, 0 }
  0x3d   : > { %s867_s4 = scalar_lea.hbm %s1023_s0, %s800_s26  ;;  %s591_s1 = scalar_lea.hbm %s1023_s0, 1536 }
  0x3e   : > { %s586_s19 = scalar_lea.hbm %s867_s4, 512  ;;  %p592_p8 = scmp.lt.u32.totalorder %s867_s4, %s1023_s0 }
  0x3f   : > { %p587_p13 = scmp.ne.s32.totalorder %s867_s4, %s586_s19  ;;  %p593_p9 = scmp.lt.u32.totalorder %s591_s1, %s586_s19 }
  0x40   : > { %p595_p3 = scmp.lt.u32.totalorder %s586_s19, %s867_s4 }
  0x41   : > { %p589_p0 = pnand %p587_p13, %p828_p2  ;;  %p594_p1 = por %p593_p9, %p592_p8 }
  0x43   : > { %p590_p4 = pneg %p589_p0  ;;  %p596_p5 = por %p595_p3, %p594_p1 }
  0x45   : > { %p597_p7 = pnand %p596_p5, %p590_p4 }
  0x47   : > { %600 = shalt.err (!%p597_p7)
}
  0x48   : > { %s601_s25 = scalar_lea.vmem %s870_s11, 512  ;;  %s722_s26 = smov [#allocation2]  }
  0x49   : > { %p602_p6 = scmp.ne.s32.totalorder %s870_s11, %s601_s25  ;;  %s606_s5 = sshll.u32 %s722_s26, 4  ;;  %s607_s5 = int_to_ptr.vmem [resolvable:$false] %s606_s5 }
  0x4a   : > { %s608_s21 = scalar_lea.vmem %s607_s5, 1024  ;;  %p609_p0 = scmp.lt.s32.totalorder %s870_s11, %s607_s5 }
  0x4b   : > { %p604_p10 = pnand %p602_p6, %p828_p2  ;;  %p610_p11 = scmp.lt.s32.totalorder %s608_s21, %s601_s25 }
  0x4d   : > { %p605_p13 = pneg %p604_p10  ;;  %p611_p8 = por %p610_p11, %p609_p0 }
  0x4f   : > { %p612_p9 = pnand %p611_p8, %p605_p13 }
  0x51   : > { %615 = shalt.err (!%p612_p9)
}
  0x52   : > { %s1024_s1 = smov 8   ;;  %s1025_s19 = smov 128  }
  0x53   : > { %s1026_s7 = smov 384   ;;  %s188_s30 = scalar_lea.vmem [#allocation7], %s804_s27 }
  0x54   : > { %502 = dma.hbm_to_vmem [thread:$0]  (!%p806_p12), %s867_s4, 512, %s870_s11, %s880_s17, %s1026_s7, %s1025_s19, %s1024_s1  }
  0x55   : > { %s194_s29 = sshll.u32 %s188_s30, 4  ;;  %s616_s6 = scalar_lea.hbm %s876_s9, 512  ;;  %s908_s29 = int_to_ptr.vmem [resolvable:$true] %s194_s29 }
  0x56   : > { %p617_p11 = scmp.ne.s32.totalorder %s876_s9, %s616_s6  ;;  %s621_s5 = scalar_lea.hbm %s1001_s2, 1536 }
  0x57   : > { %p622_p3 = scmp.lt.u32.totalorder %s876_s9, %s1001_s2  ;;  %p623_p5 = scmp.lt.u32.totalorder %s621_s5, %s616_s6 }
  0x58   : > { %p619_p4 = pnand %p617_p11, %p828_p2  ;;  %p625_p6 = scmp.lt.u32.totalorder %s616_s6, %s876_s9 }
  0x59   : > { %p624_p7 = por %p623_p5, %p622_p3 }
  0x5a   : > { %p620_p1 = pneg %p619_p4 }
  0x5b   : > { %p626_p10 = por %p625_p6, %p624_p7 }
  0x5d   : > { %p627_p13 = pnand %p626_p10, %p620_p1 }
  0x5f   : > { %630 = shalt.err (!%p627_p13)
}
  0x60   : > { %s631_s27 = scalar_lea.vmem %s908_s29, 512  ;;  %s723_s17 = smov [#allocation7]  }
  0x61   : > { %p632_p0 = scmp.ne.s32.totalorder %s908_s29, %s631_s27  ;;  %s636_s4 = sshll.u32 %s723_s17, 4  ;;  %s637_s4 = int_to_ptr.vmem [resolvable:$false] %s636_s4 }
  0x62   : > { %s638_s0 = scalar_lea.vmem %s637_s4, 1024  ;;  %p639_p11 = scmp.lt.s32.totalorder %s908_s29, %s637_s4 }
  0x63   : > { %p634_p8 = pnand %p632_p0, %p828_p2  ;;  %p640_p4 = scmp.lt.s32.totalorder %s638_s0, %s631_s27 }
  0x65   : > { %p635_p9 = pneg %p634_p8  ;;  %p641_p3 = por %p640_p4, %p639_p11 }
  0x67   : > { %p642_p5 = pnand %p641_p3, %p635_p9 }
  0x69   : > { %645 = shalt.err (!%p642_p5)
}
  0x6a   : > { %508 = dma.hbm_to_vmem [thread:$0]  (!%p806_p12), %s876_s9, 512, %s908_s29, %s822_s8, %s1026_s7, %s1025_s19, %s1024_s1  }
  0x6b   : > { %p1027_p2 = scmp.ne.s32.totalorder %s1022_s20, 0 }
  0x6c   : > { %s938_s10 = sand.u32 (!%p1027_p2), 1, %s708_s13   ;;  %p1028_p1 = scmp.ne.s32.totalorder (!%p1027_p2), %s1014_s22, 0 }
  0x6d   : > { %206 = sbr.rel (%p1027_p2) target bundleno = 196 (0xc4), region = 32  ;;  %s485_s11 = sshll.u32 (!%p1027_p2), %s938_s10, 5 }
  0x6e   : > { %s209_s30 = scalar_lea.sflag (!%p1027_p2), [#allocation3], %s938_s10  ;;  %s212_s6 = scalar_lea.vmem (!%p1027_p2), [#allocation2], %s485_s11 }
  0x74   : > { %691 = dma.done.wait (%p1028_p1), %s209_s30, 512  }
  0x75   : > { %693 = vsyncadd (%p1028_p1), %s209_s30, 4294966784  ;;  %s217_s28 = sand.u32 1, %s766_s16   ;;  %s221_s9 = scalar_lea.vmem [#allocation5], %s485_s11 }
  0x76   : > { %s218_s8 = scalar_lea.sflag [#allocation6], %s217_s28 }
  0x77   : > { %695 = dma.done.wait (%p1028_p1), %s218_s8, 1024  }
  0x78   : > { %697 = vsyncadd (%p1028_p1), %s218_s8, 4294966272  ;;  %v262_v0 = vld [vmem:[%s212_s6] sm:$0xff]  ;;  %v263_v1 = vld [vmem:[%s212_s6 + $0x8] sm:$0xff]  ;;  %s230_s20 = scalar_lea.vmem [#allocation7], %s485_s11  ;;  %s261_s22 = scalar_lea.vmem [#allocation8], %s938_s10 }
  0x79   : > { %v264_v2 = vld [vmem:[%s212_s6 + $0x10] sm:$0xff]  ;;  %v265_v3 = vld [vmem:[%s212_s6 + $0x18] sm:$0xff]  ;;  %v266_v4 = vld [vmem:[%s221_s9] sm:$0xff]  ;;  %v274_v6 = vmul.f32 %v262_v0, %v262_v0  ;;  %v275_v7 = vmul.f32 %v263_v1, %v263_v1  ;;  %s366_s1 = sshll.u32 %s261_s22, 4  ;;  %s488_s19 = sshll.u32 %s766_s16, 4  ;;  %s953_s1 = int_to_ptr.vmem [resolvable:$true] %s366_s1 }
  0x7a   : > { %v267_v5 = vld [vmem:[%s221_s9 + $0x8] sm:$0xff]  ;;  %v276_v8 = vmul.f32 %v264_v2, %v264_v2  ;;  %v268_v9 = vld [vmem:[%s221_s9 + $0x10] sm:$0xff]  ;;  %v269_v10 = vld [vmem:[%s221_s9 + $0x18] sm:$0xff]  ;;  %v293_v12 = vmul.f32 %v266_v4, %v266_v4  ;;  %v277_v17 = vmul.f32 %v265_v3, %v265_v3  ;;  %s958_s25 = scalar_lea.hbm %s1002_s3, %s488_s19  ;;  %s354_s26 = scalar_lea.sflag [#allocation4], %s938_s10 }
  0x7b   : > { %v270_v11 = vld [vmem:[%s230_s20] sm:$0xff]  ;;  %v294_v13 = vmul.f32 %v267_v5, %v267_v5  ;;  %v271_v14 = vld [vmem:[%s230_s20 + $0x8] sm:$0xff]  ;;  %v272_v15 = vld [vmem:[%s230_s20 + $0x10] sm:$0xff]  ;;  %v278_v18 = vadd.f32 %v275_v7, %v274_v6  ;;  %v295_v19 = vmul.f32 %v268_v9, %v268_v9  ;;  %v296_v21 = vmul.f32 %v269_v10, %v269_v10  ;;  %s646_s5 = scalar_lea.vmem %s953_s1, 16  ;;  %p1029_p7 = scmp.ne.s32.totalorder %s1015_s23, 0 }
  0x7c   : > { %v273_v16 = vld [vmem:[%s230_s20 + $0x18] sm:$0xff]  ;;  %v316_v20 = vmul.f32 %v270_v11, %v270_v11  ;;  %v317_v23 = vmul.f32 %v271_v14, %v271_v14  ;;  %v318_v24 = vmul.f32 %v272_v15, %v272_v15  ;;  %p647_p12 = scmp.ne.s32.totalorder %s953_s1, %s646_s5  ;;  %s724_s16 = smov [#allocation8]  }
  0x7d   : > { %v297_v22 = vadd.f32 %v294_v13, %v293_v12  ;;  %v279_v25 = vadd.f32 %v278_v18, %v276_v8  ;;  %v319_v27 = vmul.f32 %v273_v16, %v273_v16  ;;  %s650_s21 = sshll.u32 %s724_s16, 4  ;;  %s651_s21 = int_to_ptr.vmem [resolvable:$false] %s650_s21 }
  0x7e   : > { %v320_v28 = vadd.f32 %v317_v23, %v316_v20  ;;  %p648_p6 = pnand %p647_p12, %p1029_p7  ;;  %s652_s27 = scalar_lea.vmem %s651_s21, 32 }
  0x7f   : > { %v298_v26 = vadd.f32 %v297_v22, %v295_v19  ;;  %v280_v29 = vadd.f32 %v279_v25, %v277_v17  ;;  %p653_p13 = scmp.lt.s32.totalorder %s953_s1, %s651_s21  ;;  %p654_p0 = scmp.lt.s32.totalorder %s652_s27, %s646_s5 }
  0x80   : > { %v321_v31 = vadd.f32 %v320_v28, %v318_v24  ;;  %p649_p10 = pneg %p648_p6 }
  0x81   : > { %v299_v30 = vadd.f32 %v298_v26, %v296_v21  ;;  %v281_v32 = vrot.slane %v280_v29, 4  ;;  %p655_p8 = por %p654_p0, %p653_p13 }
  0x82   : > { %v322_v34 = vadd.f32 %v321_v31, %v319_v27 }
  0x83   : > { %v300_v33 = vrot.slane %v299_v30, 4  ;;  %v282_v35 = vadd.f32 %v281_v32, %v280_v29  ;;  %p656_p9 = pnand %p655_p8, %p649_p10 }
  0x84   : > { %v323_v37 = vrot.slane %v322_v34, 4 }
  0x85   : > { %v301_v36 = vadd.f32 %v300_v33, %v299_v30  ;;  %v283_v38 = vrot.slane %v282_v35, 2 }
  0x86   : > { %v324_v40 = vadd.f32 %v323_v37, %v322_v34 }
  0x87   : > { %v302_v39 = vrot.slane %v301_v36, 2  ;;  %v284_v41 = vadd.f32 %v283_v38, %v282_v35 }
  0x88   : > { %v325_v43 = vrot.slane %v324_v40, 2 }
  0x89   : > { %v303_v42 = vadd.f32 %v302_v39, %v301_v36  ;;  %v285_v44 = vrot.slane %v284_v41, 1 }
  0x8a   : > { %v326_v46 = vadd.f32 %v325_v43, %v324_v40 }
  0x8b   : > { %v304_v45 = vrot.slane %v303_v42, 1  ;;  %v286_v47 = vadd.f32 %v285_v44, %v284_v41 }
  0x8c   : > { %v327_v49 = vrot.slane %v326_v46, 1 }
  0x8d   : > { %v305_v48 = vadd.f32 %v304_v45, %v303_v42  ;;  %v287_v50 = vmax.f32 %v286_v47, 1e-24 }
  0x8e   : > { %v328_v52 = vadd.f32 %v327_v49, %v326_v46 }
  0x8f   : > { %v306_v51 = vmax.f32 %v305_v48, 1e-24  ;;  %550 = vrsqrt.f32 %v287_v50 }
  0x90   : > { %v329_v53 = vmax.f32 %v328_v52, 1e-24 }
  0x91   : > { %552 = vrsqrt.f32 %v306_v51 }
  0x92   : > { %554 = vrsqrt.f32 %v329_v53 }
  0x99   : > { %v551_v54 = vpop.eup %550 }
  0x9a   : > { %v289_v56 = vmul.f32 %v551_v54, %v262_v0  ;;  %v290_v57 = vmul.f32 %v551_v54, %v263_v1  ;;  %v291_v58 = vmul.f32 %v551_v54, %v264_v2  ;;  %v292_v59 = vmul.f32 %v551_v54, %v265_v3 }
  0x9b   : > { %v553_v55 = vpop.eup %552 }
  0x9c   : > { %v308_v60 = vmul.f32 %v553_v55, %v266_v4  ;;  %v309_v61 = vmul.f32 %v553_v55, %v267_v5  ;;  %v310_v62 = vmul.f32 %v553_v55, %v268_v9  ;;  %v311_v63 = vmul.f32 %v553_v55, %v269_v10  ;;  %v555_v6 = vpop.eup %554 }
  0x9d   : > { %v331_v17 = vmul.f32 %v555_v6, %v270_v11  ;;  %v332_v18 = vmul.f32 %v555_v6, %v271_v14  ;;  %v333_v19 = vmul.f32 %v555_v6, %v272_v15  ;;  %v334_v20 = vmul.f32 %v555_v6, %v273_v16 }
  0x9e   : > { %v312_v7 = vadd.f32 %v308_v60, %v289_v56  ;;  %v313_v8 = vadd.f32 %v309_v61, %v290_v57  ;;  %v314_v12 = vadd.f32 %v310_v62, %v291_v58  ;;  %v315_v13 = vadd.f32 %v311_v63, %v292_v59 }
  0xa0   : > { %v335_v21 = vsub.f32 %v312_v7, %v331_v17  ;;  %v336_v22 = vsub.f32 %v313_v8, %v332_v18  ;;  %v337_v0 = vsub.f32 %v314_v12, %v333_v19  ;;  %v338_v1 = vsub.f32 %v315_v13, %v334_v20 }
  0xa2   : > { %v339_v2 = vand.u32 2147483647, %v335_v21  ;;  %v340_v3 = vand.u32 2147483647, %v336_v22  ;;  %v341_v4 = vand.u32 2147483647, %v337_v0 }
  0xa3   : > { %v342_v5 = vand.u32 2147483647, %v338_v1 }
  0xa4   : > { %v343_v9 = vadd.f32 %v340_v3, %v339_v2 }
  0xa6   : > { %v344_v10 = vadd.f32 %v343_v9, %v341_v4 }
  0xa8   : > { %v345_v23 = vadd.f32 %v344_v10, %v342_v5 }
  0xaa   : > { %v346_v24 = vrot.slane %v345_v23, 4 }
  0xac   : > { %v347_v11 = vadd.f32 %v346_v24, %v345_v23 }
  0xae   : > { %v348_v14 = vrot.slane %v347_v11, 2 }
  0xb0   : > { %v349_v15 = vadd.f32 %v348_v14, %v347_v11 }
  0xb2   : > { %v350_v16 = vrot.slane %v349_v15, 1 }
  0xb4   : > { %v351_v25 = vadd.f32 %v350_v16, %v349_v15 }
  0xb6   : > { %352 = vst [vmem:[%s261_s22] sm:$0x1] %v351_v25 }
  0xb7   : > { %659 = shalt.err (!%p656_p9)
}
  0xb8   : > { %s660_s17 = scalar_lea.hbm %s958_s25, 16  ;;  %s664_s10 = scalar_lea.hbm %s1002_s3, 48 }
  0xb9   : > { %p661_p11 = scmp.ne.s32.totalorder %s958_s25, %s660_s17  ;;  %p665_p5 = scmp.lt.u32.totalorder %s958_s25, %s1002_s3 }
  0xba   : > { %p666_p2 = scmp.lt.u32.totalorder %s664_s10, %s660_s17  ;;  %p668_p12 = scmp.lt.u32.totalorder %s660_s17, %s958_s25 }
  0xbb   : > { %p662_p4 = pnand %p661_p11, %p1029_p7 }
  0xbc   : > { %p667_p1 = por %p666_p2, %p665_p5 }
  0xbd   : > { %p663_p3 = pneg %p662_p4 }
  0xbe   : > { %p669_p6 = por %p668_p12, %p667_p1 }
  0xc0   : > { %p670_p10 = pnand %p669_p6, %p663_p3 }
  0xc2   : > { %673 = shalt.err (!%p670_p10)
}
  0xc3   : > { %497 = dma.vmem_to_hbm [thread:$0]  (%p1029_p7), %s953_s1, 16, %s958_s25, %s354_s26  }
  0xc4 PF: > { %p514_p13 = scmp.ge.s32.totalorder %s716_s15, 2  ;;  %s378_s6 = sand.u32 1, %s704_s12  }
  0xc5   : > { %p1030_p0 = scmp.ne.s32.totalorder %s1016_s24, 0  ;;  %s379_s28 = scalar_lea.sflag [#allocation4], %s378_s6 }
  0xc7   : > { %p510_p8 = pnand %p514_p13, %p1030_p0 }
  0xc9   : > { %699 = dma.done.wait (!%p510_p8), %s379_s28, 16  }
  0xca   : > { %701 = vsyncadd (!%p510_p8), %s379_s28, 4294967280  ;;  %s1031_s8 = sld [smem:[#allocation12_spill]]  ;;  %p19_p9 = scmp.ge.s32.totalorder %s770_s18, 5  }
  0xcb   : > { %s1032_s12 = smov %s708_s13  ;;  %s1033_s13 = smov %s712_s14 }
  0xcc   : > { %s1035_s15 = smov %s770_s18  ;;  %21 = sbr.rel (!%p19_p9) target bundleno = 10 (0xa), region = 101 }
  0xd0   : > { %s1034_s14 = smov %s1031_s8 }
  0xd3   :  { %383 = vsyncpa [#allocation3], 1 }
  0xd4   :  { %385 = vsyncpa [#allocation3 + $0x1], 1 }
  0xd5   :  { %386 = vsyncpa [#allocation6], 1 }
  0xd6   :  { %388 = vsyncpa [#allocation6 + $0x1], 1 }
  0xd7   :  { %389 = vsyncpa [#allocation4], 1 }
  0xd8   :  { %391 = vsyncpa [#allocation4 + $0x1], 1 }

</bundles_post_ra>
